<compile_context>
chip_gen: v5e
topology: v5e:2x2
jax: 0.10.0
libtpu: 0.0.40
codegen_flags: <defaults>
</compile_context>

<pallas_src>
import jax
import jax.numpy as jnp
from jax.experimental import pallas as pl
from jax.experimental.pallas import tpu as pltpu


# ------------------------------ Pallas kernel --------------------------------
def head_kernel(x_ref, wqkv_ref, bias_ref, o_ref):
    """One causal attention head over a (Bb*T, E) activation slab.

    x_ref    : (Bb*T, E)   bf16  activations, batch folded into the matmul M-dim
    wqkv_ref : (E, 3*H)    bf16  fused Q|K|V projection (score scale folded into Wq)
    bias_ref : (T, T)      f32   additive causal mask (0 below/on diag, -1e30 above)
    o_ref    : (Bb, T, H)  f32   attention output
    """
    T = bias_ref.shape[0]
    H = wqkv_ref.shape[-1] // 3
    Bb = x_ref.shape[0] // T

    # Fused Q|K|V projection: one MXU weight push, M = Bb*T rows, f32 accumulation.
    qkv = jnp.dot(x_ref[...], wqkv_ref[...],
                  preferred_element_type=jnp.float32)          # (Bb*T, 3H) f32
    qkv = qkv.reshape(Bb, T, 3 * H)                            # sublane-only split

    # Sub-128-lane slices at offsets H/2H; XLU has slack here (profile-gated).
    q = qkv[:, :, 0 * H:1 * H].astype(jnp.bfloat16)            # scale already folded in
    k = qkv[:, :, 1 * H:2 * H].astype(jnp.bfloat16)
    v = qkv[:, :, 2 * H:3 * H].astype(jnp.bfloat16)

    # Attention scores + precomputed additive causal bias (broadcasts over batch).
    s = jnp.einsum("bqh,bkh->bqk", q, k,
                   preferred_element_type=jnp.float32)          # (Bb, T, T) f32
    s = s + bias_ref[...]

    # Numerically-stable softmax; normalization deferred until after the PV matmul
    # so only (Bb,T,H) values get scaled instead of (Bb,T,T).
    m = jnp.max(s, axis=-1, keepdims=True)
    e = jnp.exp(s - m)
    denom = jnp.sum(e, axis=-1, keepdims=True)

    # Dropout is identity (eval / p = 0).
    pv = jnp.einsum("bqk,bkh->bqh", e.astype(jnp.bfloat16), v,
                    preferred_element_type=jnp.float32)         # (Bb, T, H) f32
    o_ref[...] = pv * pl.reciprocal(denom, approx=True)         # EUP reciprocal (free slot)


# ------------------------------ wrapper ---------------------------------------
def _dual_core_chip() -> bool:
    """True on chips with 2 TensorCores per chip (v7x); single-TC chips stay gridless."""
    try:
        kind = jax.devices()[0].device_kind.lower()
    except Exception:
        return False
    return "v7" in kind or "7x" in kind


@jax.jit
def head_forward(x, wq, wk, wv):
    """Equivalent of Head.forward(x) with dropout disabled (eval mode)."""
    B, T, E = x.shape
    H = wq.shape[-1]
    scale = float(E) ** -0.5

    # Fold the score scale into Wq, fuse the three projections into one bf16 RHS,
    # and flatten the batch into the matmul M-dim (free metadata reshape here).
    wqkv = jnp.concatenate([wq * scale, wk, wv], axis=-1).astype(jnp.bfloat16)  # (E, 3H)
    x_flat = x.astype(jnp.bfloat16).reshape(B * T, E)                           # (B*T, E)

    # Precompute the causal mask once as an additive bias (tril semantics).
    row = jnp.arange(T)[:, None]
    col = jnp.arange(T)[None, :]
    bias = jnp.where(col <= row, 0.0, -1e30).astype(jnp.float32)                # (T, T)

    vmem_limit = 32 * 1024 * 1024  # far above the actual ~100 KB footprint, safe everywhere

    if _dual_core_chip():
        # v7x: shard the batch across the two TensorCores with a parallel grid axis.
        out = pl.pallas_call(
            head_kernel,
            out_shape=jax.ShapeDtypeStruct((B, T, H), jnp.float32),
            grid_spec=pltpu.PrefetchScalarGridSpec(
                num_scalar_prefetch=0,
                grid=(B,),
                in_specs=[
                    pl.BlockSpec((T, E), lambda b: (b, 0)),          # one batch slab
                    pl.BlockSpec((E, 3 * H), lambda b: (0, 0)),      # full weights
                    pl.BlockSpec((T, T), lambda b: (0, 0)),          # full causal bias
                ],
                out_specs=pl.BlockSpec((1, T, H), lambda b: (b, 0, 0)),
            ),
            compiler_params=pltpu.CompilerParams(
                dimension_semantics=("parallel",),
                vmem_limit_bytes=vmem_limit,
            ),
        )(x_flat, wqkv, bias)
    else:
        # v5e/v6e: single TensorCore -> one gridless step, everything VMEM-resident
        # (any grid over B would be pure per-step overhead at these sizes).
        out = pl.pallas_call(
            head_kernel,
            out_shape=jax.ShapeDtypeStruct((B, T, H), jnp.float32),
            in_specs=[
                pl.BlockSpec(memory_space=pltpu.MemorySpace.VMEM),
                pl.BlockSpec(memory_space=pltpu.MemorySpace.VMEM),
                pl.BlockSpec(memory_space=pltpu.MemorySpace.VMEM),
            ],
            out_specs=pl.BlockSpec(memory_space=pltpu.MemorySpace.VMEM),
            compiler_params=pltpu.CompilerParams(vmem_limit_bytes=vmem_limit),
        )(x_flat, wqkv, bias)

    return out


# ------------------------------ pure-JAX reference ----------------------------
def reference_head(x, wq, wk, wv):
    B, T, C = x.shape
    q = x @ wq
    k = x @ wk
    v = x @ wv
    s = jnp.einsum("bqh,bkh->bqk", q, k) * (C ** -0.5)
    tril = jnp.tril(jnp.ones((T, T), bool))
    s = jnp.where(tril, s, -jnp.inf)
    p = jax.nn.softmax(s, axis=-1)
    return jnp.einsum("bqk,bkh->bqh", p, v)


# ------------------------------------ main -------------------------------------
if __name__ == "__main__":
    # Shapes implied by the module: batch=2, n_blocks=T=16, emb_dim=64, head_size=16.
    B, T, E, H = 2, 16, 64, 16

    key = jax.random.PRNGKey(0)
    kx, kq, kk, kv = jax.random.split(key, 4)
    x = jax.random.normal(kx, (B, T, E), dtype=jnp.float32)
    wq = 0.02 * jax.random.normal(kq, (E, H), dtype=jnp.float32)
    wk = 0.02 * jax.random.normal(kk, (E, H), dtype=jnp.float32)
    wv = 0.02 * jax.random.normal(kv, (E, H), dtype=jnp.float32)

    out = jax.block_until_ready(head_forward(x, wq, wk, wv))
    assert out.shape == (B, T, H), out.shape

    ref = reference_head(x, wq, wk, wv)
    # Tolerance accounts for bf16 MXU inputs (f32 accumulation) + approx-reciprocal softmax.
    assert jnp.allclose(out, ref, atol=3e-3, rtol=3e-3), float(jnp.max(jnp.abs(out - ref)))

    print("KERNEL_OK")
</pallas_src>

<mosaic_0001>
module attributes {stable_mosaic.version = 11 : i64} {
  func.func @head_kernel(%arg0: memref<32x64xbf16, #tpu.memory_space<vmem>>, %arg1: memref<64x48xbf16, #tpu.memory_space<vmem>>, %arg2: memref<16x16xf32, #tpu.memory_space<vmem>>, %arg3: memref<2x16x16xf32, #tpu.memory_space<vmem>>) attributes {dimension_semantics = [], scalar_prefetch = 0 : i64, scratch_operands = 0 : i64, tpu.core_type = #tpu.core_type<tc>} {
    %c0 = arith.constant 0 : index
    %c0_0 = arith.constant 0 : index
    %0 = vector.load %arg0[%c0, %c0_0] : memref<32x64xbf16, #tpu.memory_space<vmem>>, vector<32x64xbf16>
    %c0_1 = arith.constant 0 : index
    %c0_2 = arith.constant 0 : index
    %1 = vector.load %arg1[%c0_1, %c0_2] : memref<64x48xbf16, #tpu.memory_space<vmem>>, vector<64x48xbf16>
    %cst = arith.constant dense<0.000000e+00> : vector<32x48xf32>
    %2 = tpu.matmul %0, %1, %cst {dimension_numbers = #tpu.dot_dimension_numbers<[1], [0], [0], [1], [0, 0, 1, 1], [], []>} : vector<32x64xbf16>, vector<64x48xbf16>, vector<32x48xf32> -> vector<32x48xf32>
    %3 = vector.shape_cast %2 : vector<32x48xf32> to vector<2x16x48xf32>
    %4 = vector.extract_strided_slice %3 {offsets = [0, 0, 0], sizes = [2, 16, 16], strides = [1, 1, 1]} : vector<2x16x48xf32> to vector<2x16x16xf32>
    %5 = arith.truncf %4 : vector<2x16x16xf32> to vector<2x16x16xbf16>
    %6 = vector.extract_strided_slice %3 {offsets = [0, 0, 16], sizes = [2, 16, 16], strides = [1, 1, 1]} : vector<2x16x48xf32> to vector<2x16x16xf32>
    %7 = arith.truncf %6 : vector<2x16x16xf32> to vector<2x16x16xbf16>
    %8 = vector.extract_strided_slice %3 {offsets = [0, 0, 32], sizes = [2, 16, 16], strides = [1, 1, 1]} : vector<2x16x48xf32> to vector<2x16x16xf32>
    %9 = arith.truncf %8 : vector<2x16x16xf32> to vector<2x16x16xbf16>
    "tpu.trace_start"() <{level = 10 : i32, message = "bqh,bkh->bqk"}> : () -> ()
    %cst_3 = arith.constant dense<0.000000e+00> : vector<2x16x16xf32>
    %10 = tpu.matmul %5, %7, %cst_3 {dimension_numbers = #tpu.dot_dimension_numbers<[2], [2], [1], [1], [0, 0, 0, 1, 1, 1], [0], [0]>} : vector<2x16x16xbf16>, vector<2x16x16xbf16>, vector<2x16x16xf32> -> vector<2x16x16xf32>
    "tpu.trace_stop"() : () -> ()
    %c0_4 = arith.constant 0 : index
    %c0_5 = arith.constant 0 : index
    %11 = vector.load %arg2[%c0_4, %c0_5] : memref<16x16xf32, #tpu.memory_space<vmem>>, vector<16x16xf32>
    %12 = vector.shape_cast %11 : vector<16x16xf32> to vector<1x16x16xf32>
    %13 = vector.broadcast %12 : vector<1x16x16xf32> to vector<2x16x16xf32>
    %14 = arith.addf %10, %13 : vector<2x16x16xf32>
    %cst_6 = arith.constant dense<0xFF800000> : vector<2x16xf32>
    %15 = vector.multi_reduction <maximumf>, %14, %cst_6 [2] : vector<2x16x16xf32> to vector<2x16xf32>
    %16 = vector.shape_cast %15 : vector<2x16xf32> to vector<2x16x1xf32>
    %17 = vector.broadcast %16 : vector<2x16x1xf32> to vector<2x16x16xf32>
    %18 = arith.subf %14, %17 : vector<2x16x16xf32>
    %19 = math.exp %18 : vector<2x16x16xf32>
    %cst_7 = arith.constant dense<0.000000e+00> : vector<2x16xf32>
    %20 = vector.multi_reduction <add>, %19, %cst_7 [2] : vector<2x16x16xf32> to vector<2x16xf32>
    %21 = vector.shape_cast %20 : vector<2x16xf32> to vector<2x16x1xf32>
    %22 = arith.truncf %19 : vector<2x16x16xf32> to vector<2x16x16xbf16>
    "tpu.trace_start"() <{level = 10 : i32, message = "bqk,bkh->bqh"}> : () -> ()
    %cst_8 = arith.constant dense<0.000000e+00> : vector<2x16x16xf32>
    %23 = tpu.matmul %22, %9, %cst_8 {dimension_numbers = #tpu.dot_dimension_numbers<[2], [1], [1], [2], [0, 0, 0, 1, 1, 2], [0], [0]>} : vector<2x16x16xbf16>, vector<2x16x16xbf16>, vector<2x16x16xf32> -> vector<2x16x16xf32>
    "tpu.trace_stop"() : () -> ()
    %24 = tpu.reciprocal %21 {approx = true} : vector<2x16x1xf32> -> vector<2x16x1xf32>
    %25 = vector.broadcast %24 : vector<2x16x1xf32> to vector<2x16x16xf32>
    %26 = arith.mulf %23, %25 : vector<2x16x16xf32>
    %c0_9 = arith.constant 0 : index
    %c0_10 = arith.constant 0 : index
    %c0_11 = arith.constant 0 : index
    %27 = vector.load %arg3[%c0_9, %c0_10, %c0_11] : memref<2x16x16xf32, #tpu.memory_space<vmem>>, vector<2x16x16xf32>
    tpu.vector_store %arg3[%c0_9, %c0_10, %c0_11], %26 {strides = array<i32>} : memref<2x16x16xf32, #tpu.memory_space<vmem>>, vector<2x16x16xf32>,
    return
  }
}

</mosaic_0001>

<bundles_post_ra>
// kernel: head_forward.1
= control target key start
LH: loop header
LB: loop body
LE: loop exit
PB: predicated region body
PF: predicated region fallthrough
CT: control target
= control target key end

     0   :  { %s424_s0 = inlined_call_operand.vmem [shape: bf16[32,64], index: 0, kind: input, shape index: {}]   ;;  %s425_s1 = inlined_call_operand.vmem [shape: bf16[64,48], index: 1, kind: input, shape index: {}]   ;;  %s426_s2 = inlined_call_operand.vmem [shape: f32[16,16], index: 2, kind: input, shape index: {}]   ;;  %s427_s3 = inlined_call_operand.hbm [shape: f32[2,16,16], index: 3, kind: output, shape index: {}]  }
   0x1   :  { %v304_v0 = vld [vmem:[%s425_s1 + $0x18] sm:$0xff]  ;;  %v303_v1 = vld [vmem:[%s425_s1 + $0x10] sm:$0xff] }
   0x2   :  { %73 = vmatpush.bf16.msra.mxu0 %v304_v0 }
   0x3   :  { %8 = vsyncpa [#allocation3], 0  ;;  %v302_v2 = vld [vmem:[%s425_s1 + $0x8] sm:$0xff]  ;;  %v301_v3 = vld [vmem:[%s425_s1] sm:$0xff]  ;;  %vm62_vm0 = vcmask 523264   ;;  %s352_s1 = smov 96  }
   0x4   :  { %v299_v4 = vld [vmem:[%s424_s0] sm:$0xff]  ;;  %v300_v5 = vld [vmem:[%s424_s0 + $0x8] sm:$0xff]  ;;  %s353_s24 = smov 112   ;;  %vm101_vm1 = vcmask 130048   ;;  %s257_s4 = sshll.u32 %s427_s3, 4  ;;  %s258_s4 = int_to_ptr.hbm [resolvable:$true] %s257_s4 }
   0x5   :  { %v92_v25 = vld [vmem:[%s426_s2] sm:$0xff]  ;;  %v93_v29 = vld [vmem:[%s426_s2 + $0x8] sm:$0xff]  ;;  %s354_s2 = smov [#allocation2]   ;;  %s355_s5 = smov 128  }
   0x6   :  { %74 = vmatpush.bf16.msra.mxu0 %v303_v1  ;;  %s255_s28 = sshll.u32 %s354_s2, 4  ;;  %s356_s6 = smov 8   ;;  %s256_s28 = int_to_ptr.vmem [resolvable:$true] %s255_s28 }
   0xa   :  { %75 = vmatpush.bf16.msra.mxu0 %v302_v2 }
   0xe   :  { %76 = vmatpush.bf16.msra.mxu0 %v301_v3 }
  0x11   :  { %293 = vmatmul.msk.bf16.vlgmr.msra.gmra.mxu0 %vm62_vm0, %v299_v4 }
  0x21   :  { %294 = vmatmul.msk.bf16.gmra.mxu0 %vm62_vm0, %v300_v5 }
  0x8e   :  { %v78_v6 = vpop.f32.mrf.mxu0 }
  0x8f   :  { %v88_v7 = vpack.c.bf16 %v78_v6, %v78_v6 }
  0x91   :  { %v96_v10 = vunpack.c.l.b16 %v88_v7 }
  0x96   :  { %v80_v8 = vpop.f32.mrf.mxu0 }
  0x97   :  { %v89_v9 = vpack.c.bf16 %v80_v8, %v80_v8 }
  0x99   :  { %v97_v11 = vunpack.c.l.b16 %v89_v9 }
  0x9b   :  { %v98_v12 = vpack.c.b16 %v97_v11, %v96_v10 }
  0x9d   :  { %194 = vrot.lane.b32.xlu2 %v98_v12, %s352_s1  ;;  %99 = vrot.lane.b32.xlu0 %v98_v12, %s353_s24 }
  0x9e   :  { %v83_v13 = vpop.f32.mrf.mxu0 }
  0x9f   :  { %v90_v14 = vpack.c.bf16 %v83_v13, %v83_v13 }
  0xa1   :  { %v124_v17 = vunpack.c.l.b16 %v90_v14 }
  0xa6   :  { %v85_v15 = vpop.f32.mrf.mxu0 }
  0xa7   :  { %v91_v16 = vpack.c.bf16 %v85_v15, %v85_v15 }
  0xa9   :  { %v125_v18 = vunpack.c.l.b16 %v91_v16 }
  0xab   :  { %v126_v19 = vpack.c.b16 %v125_v18, %v124_v17 }
  0xad   :  { %127 = vrot.lane.b32.xlu0 %v126_v19, %s353_s24 }
  0xf7   :  { %v195_v20 = vpop.permute.xlu2 %194 }
  0xf8   :  { %207 = vmatpush.bf16.msra.mxu3 %v195_v20 }
 0x10f   :  { %v100_v21 = vpop.permute.xlu0 %99 }
 0x110   :  { %v106_v22 = vsel %vm101_vm1, %v100_v21, 0 }
 0x111   :  { %115 = vmatpush.bf16.xpose.msra.mxu1 %v106_v22 }
 0x118   :  { %295 = vmatmul.msk.bf16.vlgmr.msra.gmra.mxu1 %vm101_vm1, %v98_v12 }
 0x11f   :  { %v128_v23 = vpop.permute.xlu0 %127 }
 0x120   :  { %v133_v24 = vsel %vm101_vm1, %v128_v23, 0 }
 0x121   :  { %142 = vmatpush.bf16.xpose.msra.mxu2 %v133_v24 }
 0x128   :  { %296 = vmatmul.msk.bf16.vlgmr.msra.gmra.mxu2 %vm101_vm1, %v126_v19 }
 0x195   :  { %v117_v26 = vpop.f32.mrf.mxu1 }
 0x196   :  { %v118_v27 = vadd.f32 %v117_v26, %v92_v25 }
 0x198   :  { %v149_v28 = vsel %vm101_vm1, %v118_v27, -inf }
 0x199   :  { %150 = vmax.xlane.f32.xlu1 %v149_v28 }
 0x19d   :  { %v119_v30 = vpop.f32.mrf.mxu1 }
 0x19e   :  { %v120_v31 = vadd.f32 %v119_v30, %v93_v29 }
 0x1a0   :  { %v152_v32 = vsel %vm101_vm1, %v120_v31, -inf }
 0x1a1   :  { %153 = vmax.xlane.f32.xlu1 %v152_v32 }
 0x1ab   :  { %v144_v33 = vpop.f32.mrf.mxu2 }
 0x1ac   :  { %v145_v34 = vadd.f32 %v144_v33, %v92_v25 }
 0x1ae   :  { %v155_v35 = vsel %vm101_vm1, %v145_v34, -inf }
 0x1af   :  { %156 = vmax.xlane.f32.xlu2 %v155_v35 }
 0x1b3   :  { %v146_v36 = vpop.f32.mrf.mxu2 }
 0x1b4   :  { %v147_v37 = vadd.f32 %v146_v36, %v93_v29 }
 0x1b6   :  { %v158_v38 = vsel %vm101_vm1, %v147_v37, -inf }
 0x1b7   :  { %159 = vmax.xlane.f32.xlu0 %v158_v38 }
 0x1ba   :  { %219 = vrot.lane.b32.xlu1 %v126_v19, %s352_s1 }
 0x20c   :  { %v151_v39 = vpop.xlane.xlu1 %150 }
 0x20d   :  { %v161_v40 = vsub.f32 %v118_v27, %v151_v39 }
 0x20f   :  { %v165_v41 = vmul.f32 1.442695, %v161_v40 }
 0x211   :  { %310 = vpow2.f32 %v165_v41 }
 0x214   :  { %v154_v42 = vpop.xlane.xlu1 %153 }
 0x215   :  { %v162_v43 = vsub.f32 %v120_v31, %v154_v42 }
 0x217   :  { %v311_v44 = vpop.eup %310  ;;  %v167_v45 = vmul.f32 1.442695, %v162_v43 }
 0x218   :  { %v173_v46 = vsel %vm101_vm1, %v311_v44, 0.0  ;;  %v185_v47 = vpack.c.bf16 %v311_v44, %v311_v44 }
 0x219   :  { %312 = vpow2.f32 %v167_v45  ;;  %174 = vadd.xlane.f32.xlu1 %v173_v46 }
 0x21a   :  { %v191_v52 = vunpack.c.l.b16 %v185_v47 }
 0x21f   :  { %v313_v48 = vpop.eup %312 }
 0x220   :  { %v176_v49 = vsel %vm101_vm1, %v313_v48, 0.0  ;;  %v186_v50 = vpack.c.bf16 %v313_v48, %v313_v48 }
 0x221   :  { %177 = vadd.xlane.f32.xlu2 %v176_v49 }
 0x222   :  { %v157_v51 = vpop.xlane.xlu2 %156  ;;  %v192_v53 = vunpack.c.l.b16 %v186_v50 }
 0x223   :  { %v163_v54 = vsub.f32 %v145_v34, %v157_v51 }
 0x224   :  { %v193_v55 = vpack.c.b16 %v192_v53, %v191_v52 }
 0x225   :  { %v169_v56 = vmul.f32 1.442695, %v163_v54 }
 0x226   :  { %297 = vmatmul.msk.bf16.vlgmr.msra.gmra.mxu3 %vm101_vm1, %v193_v55 }
 0x227   :  { %314 = vpow2.f32 %v169_v56 }
 0x22a   :  { %v160_v57 = vpop.xlane.xlu0 %159 }
 0x22b   :  { %v164_v58 = vsub.f32 %v147_v37, %v160_v57 }
 0x22c   :  { %v220_v59 = vpop.permute.xlu1 %219 }
 0x22d   :  { %v315_v60 = vpop.eup %314  ;;  %v171_v61 = vmul.f32 1.442695, %v164_v58  ;;  %232 = vmatpush.bf16.msrb.mxu3 %v220_v59 }
 0x22e   :  { %v179_v62 = vsel %vm101_vm1, %v315_v60, 0.0  ;;  %v187_v63 = vpack.c.bf16 %v315_v60, %v315_v60 }
 0x22f   :  { %316 = vpow2.f32 %v171_v61  ;;  %180 = vadd.xlane.f32.xlu2 %v179_v62 }
 0x230   :  { %v216_v3 = vunpack.c.l.b16 %v187_v63 }
 0x235   :  { %v317_v0 = vpop.eup %316 }
 0x236   :  { %v188_v1 = vpack.c.bf16 %v317_v0, %v317_v0  ;;  %v182_v2 = vsel %vm101_vm1, %v317_v0, 0.0 }
 0x237   :  { %183 = vadd.xlane.f32.xlu0 %v182_v2 }
 0x238   :  { %v217_v4 = vunpack.c.l.b16 %v188_v1 }
 0x23a   :  { %v218_v5 = vpack.c.b16 %v217_v4, %v216_v3 }
 0x23c   :  { %298 = vmatmul.msk.bf16.vlgmr.msrb.gmra.mxu3 %vm101_vm1, %v218_v5 }
 0x28c   :  { %v175_v6 = vpop.xlane.xlu1 %174 }
 0x28d   :  { %318 = vrcp.f32 %v175_v6 }
 0x293   :  { %v319_v8 = vpop.eup %318 }
 0x294   :  { %v178_v7 = vpop.xlane.xlu2 %177 }
 0x295   :  { %320 = vrcp.f32 %v178_v7 }
 0x29b   :  { %v321_v11 = vpop.eup %320 }
 0x2a2   :  { %v181_v14 = vpop.xlane.xlu2 %180 }
 0x2a3   :  { %322 = vrcp.f32 %v181_v14 }
 0x2a9   :  { %v209_v9 = vpop.f32.mrf.mxu3  ;;  %v323_v16 = vpop.eup %322 }
 0x2aa   :  { %v243_v10 = vmul.f32 %v319_v8, %v209_v9  ;;  %v184_v15 = vpop.xlane.xlu0 %183 }
 0x2ab   :  { %324 = vrcp.f32 %v184_v15 }
 0x2ac   :  { %247 = vst.msk [vmem:[#allocation2] sm:$0xff] %vm101_vm1, %v243_v10 }
 0x2b1   :  { %v211_v12 = vpop.f32.mrf.mxu3  ;;  %v325_v19 = vpop.eup %324 }
 0x2b2   :  { %v244_v13 = vmul.f32 %v321_v11, %v211_v12 }
 0x2b4   :  { %248 = vst.msk [vmem:[#allocation2 + $0x8] sm:$0xff] %vm101_vm1, %v244_v13 }
 0x2bf   :  { %v234_v17 = vpop.f32.mrf.mxu3 }
 0x2c0   :  { %v245_v18 = vmul.f32 %v323_v16, %v234_v17 }
 0x2c2   :  { %249 = vst.msk [vmem:[#allocation2 + $0x10] sm:$0xff] %vm101_vm1, %v245_v18 }
 0x2c7   :  { %v236_v20 = vpop.f32.mrf.mxu3 }
 0x2c8   :  { %v246_v21 = vmul.f32 %v325_v19, %v236_v20 }
 0x2ca   :  { %250 = vst.msk [vmem:[#allocation2 + $0x18] sm:$0xff] %vm101_vm1, %v246_v21 }
 0x2cb   :  { %263 = dma.vmem_to_hbm [thread:$0]  %s256_s28, 512, %s258_s4, [#allocation3], %s355_s5, %s355_s5, %s356_s6  }
 0x2cc   :  { %350 = dma.done.wait [#allocation3], 512  }
 0x2cd   :  { %351 = vsyncadd [#allocation3], 4294966784 }
 0x2ce   :  { %268 = vsyncpa [#allocation3], 1 }

</bundles_post_ra>
